<compile_context>
chip_gen: v5e
topology: v5e:2x2
jax: 0.10.0
libtpu: 0.0.40
codegen_flags: <defaults>
</compile_context>

<pallas_src>
import functools

import jax
import jax.numpy as jnp
from jax import lax
from jax.experimental import pallas as pl
from jax.experimental.pallas import tpu as pltpu

W_BITS = 4
A_BITS = 4
BN_EPS = 1e-5

_TM_MAX = 1024                      # GEMM rows per tile (sublane dim)
_TP_MAX = 512                       # output-channel tile (lane dim); >= any ResNet-18 planes
_VMEM_BUDGET = 30 * 1024 * 1024     # target working set (fits v7x 64 MiB w/ headroom)
_VMEM_LIMIT_BYTES = 48 * 1024 * 1024


def _round_up(x, m):
    return ((x + m - 1) // m) * m


def _cdiv(a, b):
    return (a + b - 1) // b


def _pad2(a, rows, cols):
    r, c = a.shape
    return jnp.pad(a, ((0, rows - r), (0, cols - c)))


def _mxu_operand_dtype():
    """int8 codes on integer-capable MXUs (v4/v5/v6); bf16 codes elsewhere (v7x)."""
    try:
        kind = jax.devices()[0].device_kind.lower()
    except Exception:
        return jnp.bfloat16
    if any(tag in kind for tag in ("v4", "v5", "v6")):
        return jnp.int8
    return jnp.bfloat16


# ---------------------------------------------------------------------------
# DoReFa quantizers expressed as exact integer codes.
# TODO(synk): QuantizeConv2d source is not shipped with the module; standard
# DoReFa k-bit weight/activation quantization (k >= 2) is assumed.
def quantize_weight_codes(w, bits):
    """Integer weight codes; dequantized weight == codes / (2**bits - 1)."""
    n = float(2 ** bits - 1)
    wt = jnp.tanh(w)
    denom = 2.0 * jnp.maximum(jnp.max(jnp.abs(wt)), 1e-8)   # guard all-zero weights
    wn = wt / denom + 0.5                                    # in [0, 1]
    return 2.0 * jnp.round(wn * n) - n                       # odd integers in [-n, n]


def quantize_act_codes(a, bits):
    """Integer activation codes; dequantized activation == codes / (2**bits-1)."""
    n = float(2 ** bits - 1)
    return jnp.round(jnp.clip(a, 0.0, 1.0) * n)              # integers in [0, n]


# ---------------------------------------------------------------------------
# Pallas kernels: one MXU pass per grid step + fused BN affine epilogue
# (+ residual add / next-layer activation quantization).
def _acc_dtype(op_dtype):
    return jnp.int32 if jnp.issubdtype(op_dtype, jnp.integer) else jnp.float32


def _store(o_ref, y):
    if jnp.issubdtype(o_ref.dtype, jnp.integer):
        # route f32 -> i32 -> i8 (values are exact small integers)
        o_ref[...] = y.astype(jnp.int32).astype(o_ref.dtype)
    else:
        o_ref[...] = y.astype(o_ref.dtype)


def _gemm_bn_kernel(m_ref, w_ref, scale_ref, bias_ref, o_ref, *, quant_levels):
    acc = jnp.dot(m_ref[...], w_ref[...],
                  preferred_element_type=_acc_dtype(m_ref.dtype))
    # scale_ref already carries the 1/(na*nw) dequant factor (exact fold).
    y = acc.astype(jnp.float32) * scale_ref[...] + bias_ref[...]
    if quant_levels is not None:
        # fuse the NEXT conv's activation quantization (emit integer codes)
        y = jnp.round(jnp.clip(y, 0.0, 1.0) * quant_levels)
    _store(o_ref, y)


def _gemm_bn_residual_kernel(m_ref, w_ref, res_ref, scale_ref, bias_ref, o_ref,
                             *, dequant):
    acc = jnp.dot(m_ref[...], w_ref[...],
                  preferred_element_type=_acc_dtype(m_ref.dtype))
    # identity shortcut: bn2(conv2_dequant + x), residual streamed as bf16
    y = (acc.astype(jnp.float32) * dequant + res_ref[...].astype(jnp.float32)) \
        * scale_ref[...] + bias_ref[...]
    o_ref[...] = y.astype(o_ref.dtype)


def _choose_tm(M, Kp, TP, act_bytes, out_bytes, res_bytes, n_p_tiles):
    pack = 32 if act_bytes == 1 else 16
    # double-buffered weight slab + scale/bias (f32) are TM-independent
    fixed = 2 * Kp * TP * act_bytes + 4 * TP * 4
    # per-M-row VMEM: double-buffered activation row + output row (+ residual row)
    per_row = 2 * (Kp * act_bytes + TP * out_bytes + TP * res_bytes)
    tm = (_VMEM_BUDGET - fixed) // per_row
    tm = max(pack, min(_TM_MAX, int(tm)) // pack * pack)
    tm = min(tm, _round_up(M, pack))
    # ensure >= 2 parallel grid steps on small layers so both v7x TCs get work
    if n_p_tiles * _cdiv(_round_up(M, pack), tm) < 2 and _round_up(M, pack) >= 2 * pack:
        tm = _round_up(_cdiv(M, 2), pack)
    return tm


def _gemm_bn(m, w, scale, bias, *, residual=None, res_dequant=1.0,
             quant_levels=None, out_dtype=jnp.float32):
    """out = epilogue(m @ w); m:(M,K) codes (int8/bf16), w:(K,P) codes, scale/bias:(P,)."""
    M, K = m.shape
    Kw, P = w.shape
    assert K == Kw
    op_dtype = m.dtype
    act_bytes = jnp.dtype(op_dtype).itemsize
    out_bytes = jnp.dtype(out_dtype).itemsize
    res_bytes = 2 if residual is not None else 0

    Kp = _round_up(K, 128)
    Pp = _round_up(P, 128)
    TP = Pp if Pp <= _TP_MAX else _TP_MAX
    Pp = _round_up(Pp, TP)
    TM = _choose_tm(M, Kp, TP, act_bytes, out_bytes, res_bytes, Pp // TP)
    Mp = _round_up(M, TM)

    mp = _pad2(m, Mp, Kp)
    wp = _pad2(w.astype(op_dtype), Kp, Pp)
    sp = _pad2(scale.astype(jnp.float32).reshape(1, -1), 1, Pp)
    bp = _pad2(bias.astype(jnp.float32).reshape(1, -1), 1, Pp)

    # Grid order (P, M): the resident weight / scale / bias block indices are
    # constant across the whole M sweep -> fetched once per P tile.
    in_specs = [pl.BlockSpec((TM, Kp), lambda j, i: (i, 0)),   # activations (streamed once)
                pl.BlockSpec((Kp, TP), lambda j, i: (0, j))]   # weights (VMEM-resident)
    args = [mp, wp]
    if residual is not None:
        rp = _pad2(residual.astype(jnp.bfloat16), Mp, Pp)
        in_specs.append(pl.BlockSpec((TM, TP), lambda j, i: (i, j)))
        args.append(rp)
        kernel = functools.partial(_gemm_bn_residual_kernel,
                                   dequant=float(res_dequant))
    else:
        kernel = functools.partial(_gemm_bn_kernel, quant_levels=quant_levels)
    in_specs += [pl.BlockSpec((1, TP), lambda j, i: (0, j)),
                 pl.BlockSpec((1, TP), lambda j, i: (0, j))]
    args += [sp, bp]

    out = pl.pallas_call(
        kernel,
        out_shape=jax.ShapeDtypeStruct((Mp, Pp), out_dtype),
        grid_spec=pltpu.PrefetchScalarGridSpec(
            num_scalar_prefetch=0,
            grid=(Pp // TP, Mp // TM),
            in_specs=in_specs,
            out_specs=pl.BlockSpec((TM, TP), lambda j, i: (i, j))),
        compiler_params=pltpu.CompilerParams(
            dimension_semantics=("parallel", "parallel"),
            vmem_limit_bytes=_VMEM_LIMIT_BYTES),
    )(*args)
    return out[:M, :P]


# ---------------------------------------------------------------------------
# JAX glue: patch extraction, weight reshaping, BN folding.
def _im2col(x_nhwc, ksize, stride, padding):
    # TODO(synk): implicit GEMM (shifted index_maps over padded NHWC) would avoid
    # this ~9x inflation; done here in the XLA wrapper on low-precision codes.
    N, H, W, C = x_nhwc.shape
    xp = jnp.pad(x_nhwc, ((0, 0), (padding, padding), (padding, padding), (0, 0)))
    Ho = (H + 2 * padding - ksize) // stride + 1
    Wo = (W + 2 * padding - ksize) // stride + 1
    cols = []
    for kh in range(ksize):
        for kw in range(ksize):
            cols.append(xp[:, kh:kh + Ho * stride:stride,
                           kw:kw + Wo * stride:stride, :])
    m = jnp.concatenate(cols, axis=-1)          # K index = (kh*k + kw)*C + ci
    return m.reshape(N * Ho * Wo, ksize * ksize * C), (N, Ho, Wo)


def _weight_to_gemm(w_oihw):
    Co, Ci, kh, kw = w_oihw.shape
    return jnp.transpose(w_oihw, (2, 3, 1, 0)).reshape(kh * kw * Ci, Co)


def _bn_fold(gamma, beta, mean, var):
    scale = gamma / jnp.sqrt(var + BN_EPS)
    return scale, beta - mean * scale


def basic_block_quant_forward(x_nchw, params, in_planes, planes, stride,
                              w_bits=W_BITS, a_bits=A_BITS, operand_dtype=None):
    """out = bn2( conv2(bn1(conv1(x))) + shortcut(x) ).  NCHW in / NCHW out.
    (As in the given module, there is NO ReLU inside this block.)"""
    if operand_dtype is None:
        operand_dtype = _mxu_operand_dtype()
    n_a = float(2 ** a_bits - 1)
    n_w = float(2 ** w_bits - 1)
    dequant = 1.0 / (n_a * n_w)

    # NOTE: a full network should stay NHWC end-to-end; the transposes here are
    # only at the module boundary to honour the PyTorch NCHW interface.
    x = jnp.transpose(x_nchw, (0, 2, 3, 1)).astype(jnp.float32)
    N, H, W, Cin = x.shape
    has_sc_conv = (stride != 1) or (in_planes != planes)

    # Quantize the block input ONCE (shared by conv1 and the shortcut conv).
    qx = quantize_act_codes(x, a_bits).astype(operand_dtype)

    # Integer weight codes in GEMM layout (K rows = kh*kw*Cin, lanes = Cout).
    w1c = _weight_to_gemm(quantize_weight_codes(params['w1'], w_bits))
    w2c = _weight_to_gemm(quantize_weight_codes(params['w2'], w_bits))

    s1, b1 = _bn_fold(params['bn1_gamma'], params['bn1_beta'],
                      params['bn1_mean'], params['bn1_var'])
    s2, b2 = _bn_fold(params['bn2_gamma'], params['bn2_beta'],
                      params['bn2_mean'], params['bn2_var'])

    # ---- conv1 (3x3 / stride) + bn1 + conv2's input quantization, fused -----
    m1, (N_, Ho, Wo) = _im2col(qx, 3, stride, 1)
    out1_codes = _gemm_bn(m1, w1c, s1 * dequant, b1,
                          quant_levels=n_a, out_dtype=operand_dtype)
    out1_codes = out1_codes.reshape(N, Ho, Wo, planes)

    # ---- conv2 (3x3 / 1) + shortcut + bn2, fused into one GEMM --------------
    m2, _ = _im2col(out1_codes, 3, 1, 1)
    if has_sc_conv:
        wscc = _weight_to_gemm(quantize_weight_codes(params['wsc'], w_bits))
        msc = qx[:, ::stride, ::stride, :].reshape(N * Ho * Wo, in_planes)
        # conv2 and the 1x1 shortcut conv share the same dequant scale, so their
        # GEMMs are fused by concatenating patch matrices along K.
        m_cat = jnp.concatenate([m2, msc], axis=1)
        w_cat = jnp.concatenate([w2c, wscc], axis=0)
        out2 = _gemm_bn(m_cat, w_cat, s2 * dequant, b2, out_dtype=jnp.float32)
    else:
        xid = x.reshape(N * Ho * Wo, planes)     # identity shortcut (un-quantized)
        out2 = _gemm_bn(m2, w2c, s2, b2, residual=xid, res_dequant=dequant,
                        out_dtype=jnp.float32)

    out2 = out2.reshape(N, Ho, Wo, planes)
    return jnp.transpose(out2, (0, 3, 1, 2))     # back to NCHW


# ---------------------------------------------------------------------------
# Pure-JAX reference (lax convs on the same DoReFa-quantized tensors) for
# correctness checking of the Pallas path (im2col, tiling, padding, fusion).
def reference_forward(x, params, in_planes, planes, stride,
                      w_bits=W_BITS, a_bits=A_BITS):
    n_a = float(2 ** a_bits - 1)
    n_w = float(2 ** w_bits - 1)
    dq = 1.0 / (n_a * n_w)

    def conv(a_codes, w_codes, s, pad):
        return lax.conv_general_dilated(
            a_codes, w_codes, window_strides=(s, s),
            padding=[(pad, pad), (pad, pad)],
            dimension_numbers=('NCHW', 'OIHW', 'NCHW'))

    s1, b1 = _bn_fold(params['bn1_gamma'], params['bn1_beta'],
                      params['bn1_mean'], params['bn1_var'])
    s2, b2 = _bn_fold(params['bn2_gamma'], params['bn2_beta'],
                      params['bn2_mean'], params['bn2_var'])

    qx = quantize_act_codes(x, a_bits)
    y1 = conv(qx, quantize_weight_codes(params['w1'], w_bits), stride, 1)
    out1 = y1 * (s1 * dq)[None, :, None, None] + b1[None, :, None, None]

    q1 = quantize_act_codes(out1, a_bits)
    y2 = conv(q1, quantize_weight_codes(params['w2'], w_bits), 1, 1)
    if stride != 1 or in_planes != planes:
        ysc = conv(qx, quantize_weight_codes(params['wsc'], w_bits), stride, 0)
        out = (y2 + ysc) * (s2 * dq)[None, :, None, None] + b2[None, :, None, None]
    else:
        out = (y2 * dq + x) * s2[None, :, None, None] + b2[None, :, None, None]
    return out


def init_params(key, in_planes, planes, stride):
    ks = jax.random.split(key, 12)
    p = {
        'w1': 0.2 * jax.random.normal(ks[0], (planes, in_planes, 3, 3), jnp.float32),
        'w2': 0.2 * jax.random.normal(ks[1], (planes, planes, 3, 3), jnp.float32),
        'bn1_gamma': 1.0 + 0.1 * jax.random.normal(ks[2], (planes,), jnp.float32),
        'bn1_beta': 0.1 * jax.random.normal(ks[3], (planes,), jnp.float32),
        'bn1_mean': 0.1 * jax.random.normal(ks[4], (planes,), jnp.float32),
        'bn1_var': 1.0 + 0.1 * jnp.abs(jax.random.normal(ks[5], (planes,), jnp.float32)),
        'bn2_gamma': 1.0 + 0.1 * jax.random.normal(ks[6], (planes,), jnp.float32),
        'bn2_beta': 0.1 * jax.random.normal(ks[7], (planes,), jnp.float32),
        'bn2_mean': 0.1 * jax.random.normal(ks[8], (planes,), jnp.float32),
        'bn2_var': 1.0 + 0.1 * jnp.abs(jax.random.normal(ks[9], (planes,), jnp.float32)),
    }
    if stride != 1 or in_planes != planes:
        p['wsc'] = 0.2 * jax.random.normal(ks[10], (planes, in_planes, 1, 1), jnp.float32)
    return p


if __name__ == "__main__":
    key = jax.random.PRNGKey(0)
    k1, k2, k3, k4 = jax.random.split(key, 4)

    # Block 1: downsampling block (stride 2, quantized 1x1 conv shortcut).
    in_planes, planes, stride = 4, 8, 2
    x1 = jax.random.normal(k1, (2, in_planes, 16, 16), jnp.float32)   # NCHW
    p1 = init_params(k2, in_planes, planes, stride)

    op_dtype = _mxu_operand_dtype()
    try:
        out_a = jax.block_until_ready(
            basic_block_quant_forward(x1, p1, in_planes, planes, stride,
                                      operand_dtype=op_dtype))
    except Exception:
        # Defensive fallback: if the int8 MXU path does not lower on this chip,
        # rerun with bf16 integer codes (numerically identical for 4-bit codes).
        op_dtype = jnp.bfloat16
        out_a = jax.block_until_ready(
            basic_block_quant_forward(x1, p1, in_planes, planes, stride,
                                      operand_dtype=op_dtype))
    ref_a = reference_forward(x1, p1, in_planes, planes, stride)
    assert out_a.shape == ref_a.shape == (2, planes, 8, 8), (out_a.shape, ref_a.shape)
    err_a = float(jnp.max(jnp.abs(out_a - ref_a)))
    assert jnp.allclose(out_a, ref_a, rtol=2e-2, atol=2e-2), f"max_err={err_a}"

    # Block 2: identity-shortcut block (stride 1, in_planes == planes).
    in2, planes2, stride2 = 8, 8, 1
    x2 = jax.random.normal(k3, (2, in2, 8, 8), jnp.float32)
    p2 = init_params(k4, in2, planes2, stride2)
    out_b = jax.block_until_ready(
        basic_block_quant_forward(x2, p2, in2, planes2, stride2,
                                  operand_dtype=op_dtype))
    ref_b = reference_forward(x2, p2, in2, planes2, stride2)
    assert out_b.shape == ref_b.shape == (2, planes2, 8, 8), (out_b.shape, ref_b.shape)
    err_b = float(jnp.max(jnp.abs(out_b - ref_b)))
    assert jnp.allclose(out_b, ref_b, rtol=2e-2, atol=2e-2), f"max_err={err_b}"

    print("KERNEL_OK")
</pallas_src>

<mosaic_0001>
module attributes {stable_mosaic.version = 11 : i64} {
  func.func @_gemm_bn_kernel(%arg0: i32, %arg1: i32, %arg2: memref<64x128xbf16, #tpu.memory_space<vmem>>, %arg3: memref<128x128xbf16, #tpu.memory_space<vmem>>, %arg4: memref<1x128xf32, #tpu.memory_space<vmem>>, %arg5: memref<1x128xf32, #tpu.memory_space<vmem>>, %arg6: memref<64x128xbf16, #tpu.memory_space<vmem>>) attributes {dimension_semantics = [#tpu.dimension_semantics<parallel>, #tpu.dimension_semantics<parallel>], iteration_bounds = array<i64: 1, 2>, scalar_prefetch = 0 : i64, scratch_operands = 0 : i64, tpu.core_type = #tpu.core_type<tc>, window_params = [{transform_indices = @transform_0, window_bounds = array<i64: 64, 128>}, {transform_indices = @transform_1, window_bounds = array<i64: 128, 128>}, {transform_indices = @transform_2, window_bounds = array<i64: 1, 128>}, {transform_indices = @transform_3, window_bounds = array<i64: 1, 128>}, {transform_indices = @transform_4, window_bounds = array<i64: 64, 128>}]} {
    %c0 = arith.constant 0 : index
    %c0_0 = arith.constant 0 : index
    %0 = vector.load %arg2[%c0, %c0_0] : memref<64x128xbf16, #tpu.memory_space<vmem>>, vector<64x128xbf16>
    %c0_1 = arith.constant 0 : index
    %c0_2 = arith.constant 0 : index
    %1 = vector.load %arg3[%c0_1, %c0_2] : memref<128x128xbf16, #tpu.memory_space<vmem>>, vector<128x128xbf16>
    %cst = arith.constant dense<0.000000e+00> : vector<64x128xf32>
    %2 = tpu.matmul %0, %1, %cst {dimension_numbers = #tpu.dot_dimension_numbers<[1], [0], [0], [1], [0, 0, 1, 1], [], []>} : vector<64x128xbf16>, vector<128x128xbf16>, vector<64x128xf32> -> vector<64x128xf32>
    %c0_3 = arith.constant 0 : index
    %c0_4 = arith.constant 0 : index
    %3 = vector.load %arg4[%c0_3, %c0_4] : memref<1x128xf32, #tpu.memory_space<vmem>>, vector<1x128xf32>
    %4 = vector.broadcast %3 : vector<1x128xf32> to vector<64x128xf32>
    %5 = arith.mulf %2, %4 : vector<64x128xf32>
    %c0_5 = arith.constant 0 : index
    %c0_6 = arith.constant 0 : index
    %6 = vector.load %arg5[%c0_5, %c0_6] : memref<1x128xf32, #tpu.memory_space<vmem>>, vector<1x128xf32>
    %7 = vector.broadcast %6 : vector<1x128xf32> to vector<64x128xf32>
    %8 = arith.addf %5, %7 : vector<64x128xf32>
    %cst_7 = arith.constant 0.000000e+00 : f32
    %cst_8 = arith.constant 1.000000e+00 : f32
    %9 = vector.broadcast %cst_7 : f32 to vector<64x128xf32>
    %10 = arith.maximumf %9, %8 : vector<64x128xf32>
    %11 = vector.broadcast %cst_8 : f32 to vector<64x128xf32>
    %12 = arith.minimumf %11, %10 : vector<64x128xf32>
    %cst_9 = arith.constant 1.500000e+01 : f32
    %13 = vector.broadcast %cst_9 : f32 to vector<64x128xf32>
    %14 = arith.mulf %12, %13 : vector<64x128xf32>
    %15 = math.roundeven %14 : vector<64x128xf32>
    %16 = arith.truncf %15 : vector<64x128xf32> to vector<64x128xbf16>
    %c0_10 = arith.constant 0 : index
    %c0_11 = arith.constant 0 : index
    %17 = vector.load %arg6[%c0_10, %c0_11] : memref<64x128xbf16, #tpu.memory_space<vmem>>, vector<64x128xbf16>
    tpu.vector_store %arg6[%c0_10, %c0_11], %16 {strides = array<i32>} : memref<64x128xbf16, #tpu.memory_space<vmem>>, vector<64x128xbf16>,
    return
  }
  func.func @transform_0(%arg0: i32, %arg1: i32) -> (i32, i32) {
    %c0_i32 = arith.constant 0 : i32
    %c0_i32_0 = arith.constant 0 : i32
    return %arg1, %c0_i32 : i32, i32
  }
  func.func @transform_1(%arg0: i32, %arg1: i32) -> (i32, i32) {
    %c0_i32 = arith.constant 0 : i32
    %c0_i32_0 = arith.constant 0 : i32
    return %c0_i32, %arg0 : i32, i32
  }
  func.func @transform_2(%arg0: i32, %arg1: i32) -> (i32, i32) {
    %c0_i32 = arith.constant 0 : i32
    %c0_i32_0 = arith.constant 0 : i32
    return %c0_i32, %arg0 : i32, i32
  }
  func.func @transform_3(%arg0: i32, %arg1: i32) -> (i32, i32) {
    %c0_i32 = arith.constant 0 : i32
    %c0_i32_0 = arith.constant 0 : i32
    return %c0_i32, %arg0 : i32, i32
  }
  func.func @transform_4(%arg0: i32, %arg1: i32) -> (i32, i32) {
    %c0_i32 = arith.constant 0 : i32
    return %arg1, %arg0 : i32, i32
  }
}

module attributes {stable_mosaic.version = 11 : i64} {
  func.func @_gemm_bn_kernel(%arg0: i32, %arg1: i32, %arg2: memref<64x128xbf16, #tpu.memory_space<vmem>>, %arg3: memref<128x128xbf16, #tpu.memory_space<vmem>>, %arg4: memref<1x128xf32, #tpu.memory_space<vmem>>, %arg5: memref<1x128xf32, #tpu.memory_space<vmem>>, %arg6: memref<64x128xbf16, #tpu.memory_space<vmem>>) attributes {dimension_semantics = [#tpu.dimension_semantics<parallel>, #tpu.dimension_semantics<parallel>], iteration_bounds = array<i64: 1, 2>, scalar_prefetch = 0 : i64, scratch_operands = 0 : i64, tpu.core_type = #tpu.core_type<tc>, window_params = [{transform_indices = @transform_0, window_bounds = array<i64: 64, 128>}, {transform_indices = @transform_1, window_bounds = array<i64: 128, 128>}, {transform_indices = @transform_2, window_bounds = array<i64: 1, 128>}, {transform_indices = @transform_3, window_bounds = array<i64: 1, 128>}, {transform_indices = @transform_4, window_bounds = array<i64: 64, 128>}]} {
    %c0 = arith.constant 0 : index
    %c0_0 = arith.constant 0 : index
    %0 = vector.load %arg2[%c0, %c0_0] : memref<64x128xbf16, #tpu.memory_space<vmem>>, vector<64x128xbf16>
    %c0_1 = arith.constant 0 : index
    %c0_2 = arith.constant 0 : index
    %1 = vector.load %arg3[%c0_1, %c0_2] : memref<128x128xbf16, #tpu.memory_space<vmem>>, vector<128x128xbf16>
    %cst = arith.constant dense<0.000000e+00> : vector<64x128xf32>
    %2 = tpu.matmul %0, %1, %cst {dimension_numbers = #tpu.dot_dimension_numbers<[1], [0], [0], [1], [0, 0, 1, 1], [], []>} : vector<64x128xbf16>, vector<128x128xbf16>, vector<64x128xf32> -> vector<64x128xf32>
    %c0_3 = arith.constant 0 : index
    %c0_4 = arith.constant 0 : index
    %3 = vector.load %arg4[%c0_3, %c0_4] : memref<1x128xf32, #tpu.memory_space<vmem>>, vector<1x128xf32>
    %4 = vector.broadcast %3 : vector<1x128xf32> to vector<64x128xf32>
    %5 = arith.mulf %2, %4 : vector<64x128xf32>
    %c0_5 = arith.constant 0 : index
    %c0_6 = arith.constant 0 : index
    %6 = vector.load %arg5[%c0_5, %c0_6] : memref<1x128xf32, #tpu.memory_space<vmem>>, vector<1x128xf32>
    %7 = vector.broadcast %6 : vector<1x128xf32> to vector<64x128xf32>
    %8 = arith.addf %5, %7 : vector<64x128xf32>
    %cst_7 = arith.constant 0.000000e+00 : f32
    %cst_8 = arith.constant 1.000000e+00 : f32
    %9 = vector.broadcast %cst_7 : f32 to vector<64x128xf32>
    %10 = arith.maximumf %9, %8 : vector<64x128xf32>
    %11 = vector.broadcast %cst_8 : f32 to vector<64x128xf32>
    %12 = arith.minimumf %11, %10 : vector<64x128xf32>
    %cst_9 = arith.constant 1.500000e+01 : f32
    %13 = vector.broadcast %cst_9 : f32 to vector<64x128xf32>
    %14 = arith.mulf %12, %13 : vector<64x128xf32>
    %15 = math.roundeven %14 : vector<64x128xf32>
    %16 = arith.truncf %15 : vector<64x128xf32> to vector<64x128xbf16>
    %c0_10 = arith.constant 0 : index
    %c0_11 = arith.constant 0 : index
    %17 = vector.load %arg6[%c0_10, %c0_11] : memref<64x128xbf16, #tpu.memory_space<vmem>>, vector<64x128xbf16>
    tpu.vector_store %arg6[%c0_10, %c0_11], %16 {strides = array<i32>} : memref<64x128xbf16, #tpu.memory_space<vmem>>, vector<64x128xbf16>,
    return
  }
  func.func @transform_0(%arg0: i32, %arg1: i32) -> (i32, i32) {
    %c0_i32 = arith.constant 0 : i32
    %c0_i32_0 = arith.constant 0 : i32
    return %arg1, %c0_i32 : i32, i32
  }
  func.func @transform_1(%arg0: i32, %arg1: i32) -> (i32, i32) {
    %c0_i32 = arith.constant 0 : i32
    %c0_i32_0 = arith.constant 0 : i32
    return %c0_i32, %arg0 : i32, i32
  }
  func.func @transform_2(%arg0: i32, %arg1: i32) -> (i32, i32) {
    %c0_i32 = arith.constant 0 : i32
    %c0_i32_0 = arith.constant 0 : i32
    return %c0_i32, %arg0 : i32, i32
  }
  func.func @transform_3(%arg0: i32, %arg1: i32) -> (i32, i32) {
    %c0_i32 = arith.constant 0 : i32
    %c0_i32_0 = arith.constant 0 : i32
    return %c0_i32, %arg0 : i32, i32
  }
  func.func @transform_4(%arg0: i32, %arg1: i32) -> (i32, i32) {
    %c0_i32 = arith.constant 0 : i32
    return %arg1, %arg0 : i32, i32
  }
}

</mosaic_0001>

<bundles_post_ra>
// kernel: tpu_custom_call.1
= control target key start
LH: loop header
LB: loop body
LE: loop exit
PB: predicated region body
PF: predicated region fallthrough
CT: control target
= control target key end

     0   :  { %s1282_s0 = inlined_call_operand.hbm [shape: bf16[128,128], index: 0, kind: input, shape index: {}]   ;;  %s1283_s1 = inlined_call_operand.hbm [shape: bf16[128,128], index: 1, kind: input, shape index: {}]   ;;  %s1284_s2 = inlined_call_operand.vmem [shape: f32[1,128], index: 2, kind: input, shape index: {}]   ;;  %s1285_s3 = inlined_call_operand.vmem [shape: f32[1,128], index: 3, kind: input, shape index: {}]   ;;  %s1286_s4 = inlined_call_operand.hbm [shape: bf16[128,128], index: 4, kind: output, shape index: {}]  }
   0x1   :  { %1290 = sst [smem:[#allocation12_spill]] %s1283_s1 }
   0x2   :  { %9 = vsyncpa [#allocation3], 0 }
   0x3   :  { %11 = vsyncpa [#allocation3 + $0x1], 0 }
   0x4   :  { %12 = vsyncpa [#allocation6], 0 }
   0x5   :  { %13 = vsyncpa [#allocation4], 0 }
   0x6   :  { %15 = vsyncpa [#allocation4 + $0x1], 0  ;;  %s1068_s15 = smov 0   ;;  %s1070_s16 = smov 0  }
   0x7   :  { %s1072_s17 = smov 0   ;;  %s1074_s18 = smov 0  }
   0x8   :  { %s1076_s19 = smov 0   ;;  %s1078_s20 = smov 0  }
   0x9 LB: > { %s619_s21 = sadd.s32 4294967295, %s1036_s20   ;;  %s620_s22 = sadd.s32 4294967294, %s1036_s20   ;;  %s1036_s20 = sphi %s1078_s20, %s21_s20   ;;  %s1032_s19 = sphi %s1076_s19, %s1311_s19   ;;  %s1028_s18 = sphi %s1074_s18, %s1310_s18   ;;  %s1024_s17 = sphi %s1072_s17, %s1309_s17   ;;  %s1020_s16 = sphi %s1070_s16, %s1308_s16   ;;  %s1016_s15 = sphi %s1068_s15, %s1307_s15  }
   0xa   : > { %p53_p0 = scmp.ne.s32.totalorder %s1020_s16, %s1016_s15  ;;  %p1102_p1 = scmp.eq.s32.totalorder %s619_s21, 0 }
   0xb   : > { %p1106_p2 = scmp.eq.s32.totalorder %s619_s21, 1  ;;  %p163_p3 = scmp.eq.s32.totalorder %s620_s22, 1 }
   0xc   : > { %p1112_p4 = por %p1102_p1, %p53_p0  ;;  %p621_p5 = scmp.ge.s32.totalorder %s1036_s20, 1 }
   0xd   : > { %p1117_p6 = por %p163_p3, %p53_p0  ;;  %p170_p7 = scmp.lt.s32.totalorder %s1036_s20, 3 }
   0xe   : > { %s1295_s1 = sld [smem:[#allocation12_spill]]  ;;  %s1038_s5 = smov [#allocation5]  }
   0xf   : > { %p1125_p8 = pnand %p621_p5, %p170_p7  ;;  %s185_s6 = sshll.u32 %s1038_s5, 4  ;;  %s186_s6 = int_to_ptr.vmem [resolvable:$true] %s185_s6 }
  0x10   : > { %p625_p11 = scmp.ge.s32.totalorder %s1036_s20, 2  ;;  %s1287_s7 = smov 64  }
  0x11   : > { %p819_p9 = pneg %p1125_p8  ;;  %s1288_s8 = smov 4  }
  0x12   : > { %s30_s9 = sadd.s32 1, %s1032_s19  ;;  %s40_s10 = sadd.s32 1, %s1024_s17 }
  0x13   : > { %p820_p10 = pnand %p819_p9, %p1102_p1  ;;  %p31_p12 = scmp.ge.s32.totalorder %s30_s9, 2 }
  0x14   : > { %s183_s29 = sshll.u32 %s1295_s1, 4  ;;  %p47_p13 = scmp.ne.s32.totalorder %s1024_s17, %s1020_s16  ;;  %s184_s29 = int_to_ptr.hbm [resolvable:$true] %s183_s29 }
  0x15   : > { %822 = dma.hbm_to_vmem [thread:$0]  (!%p820_p10), %s184_s29, 1024, %s186_s6, [#allocation6], %s1287_s7, %s1287_s7, %s1288_s8  }
  0x16   : > { %p48_p0 = scmp.eq.s32.totalorder %s1036_s20, 0  ;;  %s1313_s9 = smov (%p31_p12, %s30_s9), 0 }
  0x17   : > { %1297 = sst [smem:[#allocation11_spill]] %s1313_s9  ;;  %p1150_p5 = por %p1106_p2, %p47_p13 }
  0x18   : > { %p1144_p3 = por %p48_p0, %p47_p13  ;;  %s37_s13 = ssub.s32 %s1032_s19, %s1313_s9 }
  0x19   : > { %p832_p7 = scmp.lt.s32.totalorder %s1036_s20, 2  ;;  %p38_p9 = scmp.eq.s32.totalorder %s37_s13, 0 }
  0x1a   : > { %s211_s14 = sand.u32 1, %s1024_s17   ;;  %s686_s27 = sshll.u32 %s1032_s19, 5 }
  0x1b   : > { %s626_s21 = sshll.u32 %s211_s14, 5  ;;  %s220_s5 = scalar_lea.hbm %s1282_s0, %s686_s27 }
  0x1c   : > { %s1159_s22 = scalar_select %p38_p9, %s1024_s17, %s40_s10  }
  0x1d   : > { %s215_s6 = scalar_lea.vmem [#allocation2], %s626_s21  ;;  %s221_s24 = sshll.u32 %s220_s5, 4  ;;  %s222_s24 = int_to_ptr.hbm [resolvable:$true] %s221_s24 }
  0x1e   : > { %s223_s7 = sshll.u32 %s215_s6, 4  ;;  %p824_p2 = pnand %p832_p7, %p1144_p3  ;;  %s224_s7 = int_to_ptr.vmem [resolvable:$true] %s223_s7 }
  0x1f   : > { %s212_s8 = scalar_lea.sflag [#allocation3], %s211_s14  ;;  %s1300_s1 = smov 4  }
  0x20   : > { %s1301_s9 = smov 64   ;;  %235 = sbr.rel (%p1125_p8) target bundleno = 239 (0xef), region = 36 }
  0x21   : > { %826 = dma.hbm_to_vmem [thread:$0]  (!%p824_p2), %s222_s24, 512, %s224_s7, %s212_s8, %s1301_s9, %s1301_s9, %s1300_s1  }
  0x22   : > { %s1173_s10 = sand.u32 (!%p1125_p8), 1, %s1020_s16  }
  0x23   : > { %s630_s13 = sshll.u32 (!%p1125_p8), %s1173_s10, 5  ;;  %s238_s21 = scalar_lea.sflag (!%p1125_p8), [#allocation3], %s1173_s10 }
  0x24   : > { %s1179_s11 = scalar_lea.vmem (!%p1125_p8), [#allocation2], %s630_s13 }
  0x25   : > { %1003 = dma.done.wait (%p1112_p4), %s238_s21, 512  }
  0x26   : > { %1005 = vsyncadd (%p1112_p4), %s238_s21, 4294966784 }
  0x27   : > { %1007 = dma.done.wait (%p1102_p1), [#allocation6], 1024  }
  0x28   : > { %1009 = vsyncadd (%p1102_p1), [#allocation6], 4294966272  ;;  %v698_v0 = vld [vmem:[#allocation5 + $0x38] sm:$0xff]  ;;  %v697_v1 = vld [vmem:[#allocation5 + $0x30] sm:$0xff]  ;;  %s699_s7 = sshll.u32 %s1028_s18, 5  ;;  %s1234_s8 = scalar_lea.vmem [#allocation7], %s630_s13 }
  0x29   : > { %382 = vmatpush.bf16.msra.mxu0 %v698_v0  ;;  %723 = vmatpush.bf16.msra.mxu1 %v698_v0  ;;  %v696_v2 = vld [vmem:[#allocation5 + $0x28] sm:$0xff]  ;;  %v695_v3 = vld [vmem:[#allocation5 + $0x20] sm:$0xff]  ;;  %v694_v4 = vld [vmem:[#allocation5 + $0x18] sm:$0xff]  ;;  %s496_s14 = scalar_lea.hbm %s1286_s4, %s699_s7  ;;  %s497_s27 = sshll.u32 %s1234_s8, 4  ;;  %s498_s27 = int_to_ptr.vmem [resolvable:$true] %s497_s27 }
  0x2a   : > { %724 = vmatpush.bf16.msra.mxu2 %v698_v0  ;;  %725 = vmatpush.bf16.msra.mxu3 %v698_v0  ;;  %v693_v5 = vld [vmem:[#allocation5 + $0x10] sm:$0xff]  ;;  %v692_v6 = vld [vmem:[#allocation5 + $0x8] sm:$0xff]  ;;  %v691_v7 = vld [vmem:[#allocation5] sm:$0xff]  ;;  %s499_s28 = sshll.u32 %s496_s14, 4  ;;  %s484_s29 = scalar_lea.sflag [#allocation4], %s1173_s10  ;;  %s500_s28 = int_to_ptr.hbm [resolvable:$true] %s499_s28 }
  0x2b   : > { %v687_v8 = vld [vmem:[%s1179_s11] sm:$0xff]  ;;  %v688_v9 = vld [vmem:[%s1179_s11 + $0x8] sm:$0xff]  ;;  %v689_v10 = vld [vmem:[%s1179_s11 + $0x10] sm:$0xff]  ;;  %s964_s5 = sshra.s32 %s500_s28, 4  ;;  %s970_s21 = scalar_lea.hbm %s1286_s4, 64  ;;  %s965_s5 = int_to_ptr.hbm [resolvable:$true] %s964_s5 }
  0x2c   : > { %v690_v11 = vld [vmem:[%s1179_s11 + $0x18] sm:$0xff]  ;;  %v888_v12 = vld [vmem:[%s1284_s2] ss:$0 sm:$0xff]  ;;  %s966_s6 = scalar_lea.hbm %s965_s5, 32  ;;  %p971_p10 = scmp.lt.s32.totalorder %s965_s5, %s1286_s4 }
  0x2d   : > { %383 = vmatpush.bf16.msra.mxu0 %v697_v1  ;;  %726 = vmatpush.bf16.msra.mxu1 %v697_v1  ;;  %v889_v13 = vld [vmem:[%s1285_s3] ss:$0 sm:$0xff]  ;;  %p967_p1 = scmp.ne.s32.totalorder %s965_s5, %s966_s6  ;;  %p972_p12 = scmp.lt.s32.totalorder %s970_s21, %s966_s6 }
  0x2e   : > { %727 = vmatpush.bf16.msra.mxu2 %v697_v1  ;;  %728 = vmatpush.bf16.msra.mxu3 %v697_v1 }
  0x2f   : > { %p968_p4 = pnand %p967_p1, %p1150_p5  ;;  %p973_p13 = por %p972_p12, %p971_p10 }
  0x31   : > { %384 = vmatpush.bf16.msra.mxu0 %v696_v2  ;;  %729 = vmatpush.bf16.msra.mxu1 %v696_v2  ;;  %p969_p8 = pneg %p968_p4 }
  0x32   : > { %730 = vmatpush.bf16.msra.mxu2 %v696_v2  ;;  %731 = vmatpush.bf16.msra.mxu3 %v696_v2 }
  0x33   : > { %p974_p0 = pnand %p973_p13, %p969_p8 }
  0x35   : > { %385 = vmatpush.bf16.msra.mxu0 %v695_v3  ;;  %732 = vmatpush.bf16.msra.mxu1 %v695_v3 }
  0x36   : > { %733 = vmatpush.bf16.msra.mxu2 %v695_v3  ;;  %734 = vmatpush.bf16.msra.mxu3 %v695_v3 }
  0x39   : > { %386 = vmatpush.bf16.msra.mxu0 %v694_v4  ;;  %735 = vmatpush.bf16.msra.mxu1 %v694_v4 }
  0x3a   : > { %736 = vmatpush.bf16.msra.mxu2 %v694_v4  ;;  %737 = vmatpush.bf16.msra.mxu3 %v694_v4 }
  0x3d   : > { %387 = vmatpush.bf16.msra.mxu0 %v693_v5  ;;  %738 = vmatpush.bf16.msra.mxu1 %v693_v5 }
  0x3e   : > { %739 = vmatpush.bf16.msra.mxu2 %v693_v5  ;;  %740 = vmatpush.bf16.msra.mxu3 %v693_v5 }
  0x41   : > { %388 = vmatpush.bf16.msra.mxu0 %v692_v6  ;;  %741 = vmatpush.bf16.msra.mxu1 %v692_v6 }
  0x42   : > { %742 = vmatpush.bf16.msra.mxu2 %v692_v6  ;;  %743 = vmatpush.bf16.msra.mxu3 %v692_v6 }
  0x45   : > { %389 = vmatpush.bf16.msra.mxu0 %v691_v7  ;;  %744 = vmatpush.bf16.msra.mxu1 %v691_v7 }
  0x46   : > { %745 = vmatpush.bf16.msra.mxu2 %v691_v7  ;;  %746 = vmatpush.bf16.msra.mxu3 %v691_v7 }
  0x48   : > { %390 = vmatmul.bf16.vlgmr.msra.gmra.mxu0 %v687_v8  ;;  %395 = vmatmul.bf16.vlgmr.msra.gmra.mxu1 %v688_v9 }
  0x49   : > { %400 = vmatmul.bf16.vlgmr.msra.gmra.mxu2 %v689_v10  ;;  %405 = vmatmul.bf16.vlgmr.msra.gmra.mxu3 %v690_v11 }
  0xc5   : > { %v391_v14 = vpop.f32.mrf.mxu0  ;;  %v396_v15 = vpop.f32.mrf.mxu1 }
  0xc6   : > { %v415_v16 = vmul.f32 %v888_v12, %v391_v14  ;;  %v417_v17 = vmul.f32 %v888_v12, %v396_v15 }
  0xc8   : > { %v427_v18 = vadd.f32 %v889_v13, %v415_v16  ;;  %v429_v19 = vadd.f32 %v889_v13, %v417_v17 }
  0xca   : > { %v435_v20 = vmax.f32 %v427_v18, 0.0  ;;  %v437_v21 = vmax.f32 %v429_v19, 0.0 }
  0xcc   : > { %v443_v22 = vmin.f32 %v435_v20, 1.0  ;;  %v445_v23 = vmin.f32 %v437_v21, 1.0  ;;  %v401_v24 = vpop.f32.mrf.mxu2  ;;  %v406_v25 = vpop.f32.mrf.mxu3 }
  0xcd   : > { %v419_v26 = vmul.f32 %v888_v12, %v401_v24  ;;  %v421_v27 = vmul.f32 %v888_v12, %v406_v25  ;;  %v393_v28 = vpop.f32.mrf.mxu0  ;;  %v398_v29 = vpop.f32.mrf.mxu1 }
  0xce   : > { %v1199_v30 = vmul.f32 15.0, %v443_v22  ;;  %v416_v31 = vmul.f32 %v888_v12, %v393_v28  ;;  %v418_v34 = vmul.f32 %v888_v12, %v398_v29  ;;  %v1201_v35 = vmul.f32 15.0, %v445_v23 }
  0xcf   : > { %v431_v32 = vadd.f32 %v889_v13, %v419_v26  ;;  %v433_v33 = vadd.f32 %v889_v13, %v421_v27 }
  0xd0   : > { %v749_v36 = vcvt.f32.s32 %v1199_v30  ;;  %v428_v39 = vadd.f32 %v889_v13, %v416_v31  ;;  %v430_v41 = vadd.f32 %v889_v13, %v418_v34  ;;  %v765_v42 = vcvt.f32.s32 %v1201_v35 }
  0xd1   : > { %v439_v37 = vmax.f32 %v431_v32, 0.0  ;;  %v441_v38 = vmax.f32 %v433_v33, 0.0  ;;  %v752_v55 = vand.u32 2147483648, %v1199_v30  ;;  %v747_v61 = vand.u32 2147483647, %v1199_v30 }
  0xd2   : > { %v436_v43 = vmax.f32 %v428_v39, 0.0  ;;  %v750_v45 = vcvt.s32.f32 %v749_v36  ;;  %v438_v50 = vmax.f32 %v430_v41, 0.0  ;;  %v766_v52 = vcvt.s32.f32 %v765_v42 }
  0xd3   : > { %v447_v40 = vmin.f32 %v439_v37, 1.0  ;;  %v449_v46 = vmin.f32 %v441_v38, 1.0  ;;  %v763_v62 = vand.u32 2147483647, %v1201_v35  ;;  %v768_v63 = vand.u32 2147483648, %v1201_v35 }
  0xd4   : > { %v403_v44 = vpop.f32.mrf.mxu2  ;;  %v408_v47 = vpop.f32.mrf.mxu3  ;;  %v444_v49 = vmin.f32 %v436_v43, 1.0  ;;  %v751_v54 = vand.u32 2147483647, %v750_v45  ;;  %v446_v59 = vmin.f32 %v438_v50, 1.0  ;;  %v767_v1 = vand.u32 2147483647, %v766_v52 }
  0xd5   : > { %v1205_v48 = vmul.f32 15.0, %v447_v40  ;;  %v420_v51 = vmul.f32 %v888_v12, %v403_v44  ;;  %v422_v53 = vmul.f32 %v888_v12, %v408_v47  ;;  %v1209_v58 = vmul.f32 15.0, %v449_v46 }
  0xd6   : > { %v452_v56 = vmul.f32 15.0, %v444_v49  ;;  %v454_v2 = vmul.f32 15.0, %v446_v59  ;;  %v753_v5 = vor.u32 %v752_v55, %v751_v54  ;;  %vm1215_vm0 = vcmp.lt.f32.partialorder %v747_v61, 8388608.0 }
  0xd7   : > { %v781_v57 = vcvt.f32.s32 %v1205_v48  ;;  %v432_v60 = vadd.f32 %v889_v13, %v420_v51  ;;  %v434_v4 = vadd.f32 %v889_v13, %v422_v53  ;;  %v797_v8 = vcvt.f32.s32 %v1209_v58 }
  0xd8   : > { %v757_v0 = vcvt.f32.s32 %v452_v56  ;;  %v755_v9 = vand.u32 2147483647, %v452_v56  ;;  %v773_v10 = vcvt.f32.s32 %v454_v2  ;;  %v760_v12 = vand.u32 2147483648, %v452_v56 }
  0xd9   : > { %v440_v3 = vmax.f32 %v432_v60, 0.0  ;;  %v782_v7 = vcvt.s32.f32 %v781_v57  ;;  %v442_v15 = vmax.f32 %v434_v4, 0.0  ;;  %vm1219_vm1 = vcmp.lt.f32.partialorder %v763_v62, 8388608.0 }
  0xda   : > { %v758_v6 = vcvt.s32.f32 %v757_v0  ;;  %v769_v13 = vor.u32 %v768_v63, %v767_v1  ;;  %v774_v18 = vcvt.s32.f32 %v773_v10  ;;  %v771_v20 = vand.u32 2147483647, %v454_v2 }
  0xdb   : > { %v448_v14 = vmin.f32 %v440_v3, 1.0  ;;  %v450_v22 = vmin.f32 %v442_v15, 1.0  ;;  %v798_v23 = vcvt.s32.f32 %v797_v8  ;;  %vm756_vm2 = vcmp.lt.f32.partialorder %v755_v9, 8388608.0 }
  0xdc   : > { %v759_v11 = vand.u32 2147483647, %v758_v6  ;;  %v775_v24 = vand.u32 2147483647, %v774_v18  ;;  %v776_v25 = vand.u32 2147483648, %v454_v2  ;;  %v754_v26 = vsel %vm1215_vm0, %v753_v5, %v1199_v30 }
  0xdd   : > { %v456_v21 = vmul.f32 15.0, %v448_v14  ;;  %v783_v27 = vand.u32 2147483647, %v782_v7  ;;  %v779_v31 = vand.u32 2147483647, %v1205_v48  ;;  %v458_v34 = vmul.f32 15.0, %v450_v22 }
  0xde   : > { %v761_v19 = vor.u32 %v760_v12, %v759_v11  ;;  %v777_v33 = vor.u32 %v776_v25, %v775_v24  ;;  %v770_v36 = vsel %vm1219_vm1, %v769_v13, %v1201_v35  ;;  %v784_v37 = vand.u32 2147483648, %v1205_v48 }
  0xdf   : > { %v789_v29 = vcvt.f32.s32 %v456_v21  ;;  %vm772_vm3 = vcmp.lt.f32.partialorder %v771_v20, 8388608.0  ;;  %v799_v39 = vand.u32 2147483647, %v798_v23  ;;  %v787_v40 = vand.u32 2147483647, %v456_v21 }
  0xe0   : > { %v762_v28 = vsel %vm756_vm2, %v761_v19, %v452_v56  ;;  %v778_v30 = vsel %vm772_vm3, %v777_v33, %v454_v2  ;;  %v805_v41 = vcvt.f32.s32 %v458_v34  ;;  %v785_v42 = vor.u32 %v784_v37, %v783_v27 }
  0xe1   : > { %v703_v32 = vpack.c.bf16 %v762_v28, %v754_v26  ;;  %v790_v38 = vcvt.s32.f32 %v789_v29  ;;  %v708_v43 = vpack.c.bf16 %v778_v30, %v770_v36  ;;  %v792_v35 = vand.u32 2147483648, %v456_v21 }
  0xe2   : > { %v800_v45 = vand.u32 2147483648, %v1209_v58  ;;  %v806_v46 = vcvt.s32.f32 %v805_v41  ;;  %vm780_vm4 = vcmp.lt.f32.partialorder %v779_v31, 8388608.0  ;;  %v795_v47 = vand.u32 2147483647, %v1209_v58 }
  0xe3   : > { %704 = vst [vmem:[%s1234_s8] sm:$0xff] %v703_v32   ;;  %v791_v44 = vand.u32 2147483647, %v790_v38  ;;  %v803_v50 = vand.u32 2147483647, %v458_v34  ;;  %vm788_vm5 = vcmp.lt.f32.partialorder %v787_v40, 8388608.0  ;;  %v808_v53 = vand.u32 2147483648, %v458_v34 }
  0xe4   : > { %720 = vst [vmem:[%s1234_s8 + $0x8] sm:$0xff] %v708_v43   ;;  %v801_v51 = vor.u32 %v800_v45, %v799_v39  ;;  %v807_v52 = vand.u32 2147483647, %v806_v46  ;;  %v786_v54 = vsel %vm780_vm4, %v785_v42, %v1205_v48  ;;  %vm796_vm6 = vcmp.lt.f32.partialorder %v795_v47, 8388608.0 }
  0xe5   : > { %v793_v49 = vor.u32 %v792_v35, %v791_v44  ;;  %vm804_vm7 = vcmp.lt.f32.partialorder %v803_v50, 8388608.0 }
  0xe6   : > { %v809_v57 = vor.u32 %v808_v53, %v807_v52  ;;  %v802_v59 = vsel %vm796_vm6, %v801_v51, %v1209_v58 }
  0xe7   : > { %v794_v55 = vsel %vm788_vm5, %v793_v49, %v456_v21 }
  0xe8   : > { %v713_v56 = vpack.c.bf16 %v794_v55, %v786_v54  ;;  %v810_v60 = vsel %vm804_vm7, %v809_v57, %v458_v34 }
  0xe9   : > { %v718_v61 = vpack.c.bf16 %v810_v60, %v802_v59 }
  0xea   : > { %721 = vst [vmem:[%s1234_s8 + $0x10] sm:$0xff] %v713_v56  }
  0xeb   : > { %722 = vst [vmem:[%s1234_s8 + $0x18] sm:$0xff] %v718_v61  }
  0xec   : > { %977 = shalt.err (!%p974_p0)
}
  0xed   : > { %s1041_s10 = smov 64   ;;  %s1042_s23 = smov 4  }
  0xee   : > { %817 = dma.vmem_to_hbm [thread:$0]  (%p1150_p5), %s498_s27, 512, %s500_s28, %s484_s29, %s1041_s10, %s1041_s10, %s1042_s23  }
  0xef PF: > { %s514_s25 = sand.u32 1, %s1016_s15   ;;  %p828_p3 = pnand %p625_p11, %p1117_p6 }
  0xf0   : > { %s515_s30 = scalar_lea.sflag [#allocation4], %s514_s25 }
  0xf1   : > { %p829_p7 = pneg %p828_p3 }
  0xf3   : > { %1011 = dma.done.wait (%p829_p7), %s515_s30, 512  }
  0xf4   : > { %1013 = vsyncadd (%p829_p7), %s515_s30, 4294966784  ;;  %s21_s20 = sadd.s32 1, %s1036_s20   ;;  %s1306_s12 = sld [smem:[#allocation11_spill]] }
  0xf5   : > { %p18_p9 = scmp.ge.s32.totalorder %s21_s20, 4   ;;  %s1307_s15 = smov %s1020_s16 }
  0xf6   : > { %s1308_s16 = smov %s1024_s17  ;;  %s1309_s17 = smov %s1159_s22 }
  0xf7   : > { %s1310_s18 = smov %s1032_s19  ;;  %20 = sbr.rel (!%p18_p9) target bundleno = 9 (0x9), region = 92 }
  0xfa   : > { %s1311_s19 = smov %s1306_s12 }
  0xfc   :  { %521 = vsyncpa [#allocation3], 1 }
  0xfd   :  { %523 = vsyncpa [#allocation3 + $0x1], 1 }
  0xfe   :  { %524 = vsyncpa [#allocation6], 1 }
  0xff   :  { %525 = vsyncpa [#allocation4], 1 }
 0x100   :  { %527 = vsyncpa [#allocation4 + $0x1], 1 }

// kernel: tpu_custom_call.1
= control target key start
LH: loop header
LB: loop body
LE: loop exit
PB: predicated region body
PF: predicated region fallthrough
CT: control target
= control target key end

     0   :  { %s1282_s0 = inlined_call_operand.hbm [shape: bf16[128,128], index: 0, kind: input, shape index: {}]   ;;  %s1283_s1 = inlined_call_operand.hbm [shape: bf16[128,128], index: 1, kind: input, shape index: {}]   ;;  %s1284_s2 = inlined_call_operand.vmem [shape: f32[1,128], index: 2, kind: input, shape index: {}]   ;;  %s1285_s3 = inlined_call_operand.vmem [shape: f32[1,128], index: 3, kind: input, shape index: {}]   ;;  %s1286_s4 = inlined_call_operand.hbm [shape: bf16[128,128], index: 4, kind: output, shape index: {}]  }
   0x1   :  { %1290 = sst [smem:[#allocation12_spill]] %s1283_s1 }
   0x2   :  { %9 = vsyncpa [#allocation3], 0 }
   0x3   :  { %11 = vsyncpa [#allocation3 + $0x1], 0 }
   0x4   :  { %12 = vsyncpa [#allocation6], 0 }
   0x5   :  { %13 = vsyncpa [#allocation4], 0 }
   0x6   :  { %15 = vsyncpa [#allocation4 + $0x1], 0  ;;  %s1068_s15 = smov 0   ;;  %s1070_s16 = smov 0  }
   0x7   :  { %s1072_s17 = smov 0   ;;  %s1074_s18 = smov 0  }
   0x8   :  { %s1076_s19 = smov 0   ;;  %s1078_s20 = smov 0  }
   0x9 LB: > { %s619_s21 = sadd.s32 4294967295, %s1036_s20   ;;  %s620_s22 = sadd.s32 4294967294, %s1036_s20   ;;  %s1036_s20 = sphi %s1078_s20, %s21_s20   ;;  %s1032_s19 = sphi %s1076_s19, %s1311_s19   ;;  %s1028_s18 = sphi %s1074_s18, %s1310_s18   ;;  %s1024_s17 = sphi %s1072_s17, %s1309_s17   ;;  %s1020_s16 = sphi %s1070_s16, %s1308_s16   ;;  %s1016_s15 = sphi %s1068_s15, %s1307_s15  }
   0xa   : > { %p53_p0 = scmp.ne.s32.totalorder %s1020_s16, %s1016_s15  ;;  %p1102_p1 = scmp.eq.s32.totalorder %s619_s21, 0 }
   0xb   : > { %p1106_p2 = scmp.eq.s32.totalorder %s619_s21, 1  ;;  %p163_p3 = scmp.eq.s32.totalorder %s620_s22, 1 }
   0xc   : > { %p1112_p4 = por %p1102_p1, %p53_p0  ;;  %p621_p5 = scmp.ge.s32.totalorder %s1036_s20, 1 }
   0xd   : > { %p1117_p6 = por %p163_p3, %p53_p0  ;;  %p170_p7 = scmp.lt.s32.totalorder %s1036_s20, 3 }
   0xe   : > { %s1295_s1 = sld [smem:[#allocation12_spill]]  ;;  %s1038_s5 = smov [#allocation5]  }
   0xf   : > { %p1125_p8 = pnand %p621_p5, %p170_p7  ;;  %s185_s6 = sshll.u32 %s1038_s5, 4  ;;  %s186_s6 = int_to_ptr.vmem [resolvable:$true] %s185_s6 }
  0x10   : > { %p625_p11 = scmp.ge.s32.totalorder %s1036_s20, 2  ;;  %s1287_s7 = smov 64  }
  0x11   : > { %p819_p9 = pneg %p1125_p8  ;;  %s1288_s8 = smov 4  }
  0x12   : > { %s30_s9 = sadd.s32 1, %s1032_s19  ;;  %s40_s10 = sadd.s32 1, %s1024_s17 }
  0x13   : > { %p820_p10 = pnand %p819_p9, %p1102_p1  ;;  %p31_p12 = scmp.ge.s32.totalorder %s30_s9, 2 }
  0x14   : > { %s183_s29 = sshll.u32 %s1295_s1, 4  ;;  %p47_p13 = scmp.ne.s32.totalorder %s1024_s17, %s1020_s16  ;;  %s184_s29 = int_to_ptr.hbm [resolvable:$true] %s183_s29 }
  0x15   : > { %822 = dma.hbm_to_vmem [thread:$0]  (!%p820_p10), %s184_s29, 1024, %s186_s6, [#allocation6], %s1287_s7, %s1287_s7, %s1288_s8  }
  0x16   : > { %p48_p0 = scmp.eq.s32.totalorder %s1036_s20, 0  ;;  %s1313_s9 = smov (%p31_p12, %s30_s9), 0 }
  0x17   : > { %1297 = sst [smem:[#allocation11_spill]] %s1313_s9  ;;  %p1150_p5 = por %p1106_p2, %p47_p13 }
  0x18   : > { %p1144_p3 = por %p48_p0, %p47_p13  ;;  %s37_s13 = ssub.s32 %s1032_s19, %s1313_s9 }
  0x19   : > { %p832_p7 = scmp.lt.s32.totalorder %s1036_s20, 2  ;;  %p38_p9 = scmp.eq.s32.totalorder %s37_s13, 0 }
  0x1a   : > { %s211_s14 = sand.u32 1, %s1024_s17   ;;  %s686_s27 = sshll.u32 %s1032_s19, 5 }
  0x1b   : > { %s626_s21 = sshll.u32 %s211_s14, 5  ;;  %s220_s5 = scalar_lea.hbm %s1282_s0, %s686_s27 }
  0x1c   : > { %s1159_s22 = scalar_select %p38_p9, %s1024_s17, %s40_s10  }
  0x1d   : > { %s215_s6 = scalar_lea.vmem [#allocation2], %s626_s21  ;;  %s221_s24 = sshll.u32 %s220_s5, 4  ;;  %s222_s24 = int_to_ptr.hbm [resolvable:$true] %s221_s24 }
  0x1e   : > { %s223_s7 = sshll.u32 %s215_s6, 4  ;;  %p824_p2 = pnand %p832_p7, %p1144_p3  ;;  %s224_s7 = int_to_ptr.vmem [resolvable:$true] %s223_s7 }
  0x1f   : > { %s212_s8 = scalar_lea.sflag [#allocation3], %s211_s14  ;;  %s1300_s1 = smov 4  }
  0x20   : > { %s1301_s9 = smov 64   ;;  %235 = sbr.rel (%p1125_p8) target bundleno = 239 (0xef), region = 36 }
  0x21   : > { %826 = dma.hbm_to_vmem [thread:$0]  (!%p824_p2), %s222_s24, 512, %s224_s7, %s212_s8, %s1301_s9, %s1301_s9, %s1300_s1  }
  0x22   : > { %s1173_s10 = sand.u32 (!%p1125_p8), 1, %s1020_s16  }
  0x23   : > { %s630_s13 = sshll.u32 (!%p1125_p8), %s1173_s10, 5  ;;  %s238_s21 = scalar_lea.sflag (!%p1125_p8), [#allocation3], %s1173_s10 }
  0x24   : > { %s1179_s11 = scalar_lea.vmem (!%p1125_p8), [#allocation2], %s630_s13 }
  0x25   : > { %1003 = dma.done.wait (%p1112_p4), %s238_s21, 512  }
  0x26   : > { %1005 = vsyncadd (%p1112_p4), %s238_s21, 4294966784 }
  0x27   : > { %1007 = dma.done.wait (%p1102_p1), [#allocation6], 1024  }
  0x28   : > { %1009 = vsyncadd (%p1102_p1), [#allocation6], 4294966272  ;;  %v698_v0 = vld [vmem:[#allocation5 + $0x38] sm:$0xff]  ;;  %v697_v1 = vld [vmem:[#allocation5 + $0x30] sm:$0xff]  ;;  %s699_s7 = sshll.u32 %s1028_s18, 5  ;;  %s1234_s8 = scalar_lea.vmem [#allocation7], %s630_s13 }
  0x29   : > { %382 = vmatpush.bf16.msra.mxu0 %v698_v0  ;;  %723 = vmatpush.bf16.msra.mxu1 %v698_v0  ;;  %v696_v2 = vld [vmem:[#allocation5 + $0x28] sm:$0xff]  ;;  %v695_v3 = vld [vmem:[#allocation5 + $0x20] sm:$0xff]  ;;  %v694_v4 = vld [vmem:[#allocation5 + $0x18] sm:$0xff]  ;;  %s496_s14 = scalar_lea.hbm %s1286_s4, %s699_s7  ;;  %s497_s27 = sshll.u32 %s1234_s8, 4  ;;  %s498_s27 = int_to_ptr.vmem [resolvable:$true] %s497_s27 }
  0x2a   : > { %724 = vmatpush.bf16.msra.mxu2 %v698_v0  ;;  %725 = vmatpush.bf16.msra.mxu3 %v698_v0  ;;  %v693_v5 = vld [vmem:[#allocation5 + $0x10] sm:$0xff]  ;;  %v692_v6 = vld [vmem:[#allocation5 + $0x8] sm:$0xff]  ;;  %v691_v7 = vld [vmem:[#allocation5] sm:$0xff]  ;;  %s499_s28 = sshll.u32 %s496_s14, 4  ;;  %s484_s29 = scalar_lea.sflag [#allocation4], %s1173_s10  ;;  %s500_s28 = int_to_ptr.hbm [resolvable:$true] %s499_s28 }
  0x2b   : > { %v687_v8 = vld [vmem:[%s1179_s11] sm:$0xff]  ;;  %v688_v9 = vld [vmem:[%s1179_s11 + $0x8] sm:$0xff]  ;;  %v689_v10 = vld [vmem:[%s1179_s11 + $0x10] sm:$0xff]  ;;  %s964_s5 = sshra.s32 %s500_s28, 4  ;;  %s970_s21 = scalar_lea.hbm %s1286_s4, 64  ;;  %s965_s5 = int_to_ptr.hbm [resolvable:$true] %s964_s5 }
  0x2c   : > { %v690_v11 = vld [vmem:[%s1179_s11 + $0x18] sm:$0xff]  ;;  %v888_v12 = vld [vmem:[%s1284_s2] ss:$0 sm:$0xff]  ;;  %s966_s6 = scalar_lea.hbm %s965_s5, 32  ;;  %p971_p10 = scmp.lt.s32.totalorder %s965_s5, %s1286_s4 }
  0x2d   : > { %383 = vmatpush.bf16.msra.mxu0 %v697_v1  ;;  %726 = vmatpush.bf16.msra.mxu1 %v697_v1  ;;  %v889_v13 = vld [vmem:[%s1285_s3] ss:$0 sm:$0xff]  ;;  %p967_p1 = scmp.ne.s32.totalorder %s965_s5, %s966_s6  ;;  %p972_p12 = scmp.lt.s32.totalorder %s970_s21, %s966_s6 }
  0x2e   : > { %727 = vmatpush.bf16.msra.mxu2 %v697_v1  ;;  %728 = vmatpush.bf16.msra.mxu3 %v697_v1 }
  0x2f   : > { %p968_p4 = pnand %p967_p1, %p1150_p5  ;;  %p973_p13 = por %p972_p12, %p971_p10 }
  0x31   : > { %384 = vmatpush.bf16.msra.mxu0 %v696_v2  ;;  %729 = vmatpush.bf16.msra.mxu1 %v696_v2  ;;  %p969_p8 = pneg %p968_p4 }
  0x32   : > { %730 = vmatpush.bf16.msra.mxu2 %v696_v2  ;;  %731 = vmatpush.bf16.msra.mxu3 %v696_v2 }
  0x33   : > { %p974_p0 = pnand %p973_p13, %p969_p8 }
  0x35   : > { %385 = vmatpush.bf16.msra.mxu0 %v695_v3  ;;  %732 = vmatpush.bf16.msra.mxu1 %v695_v3 }
  0x36   : > { %733 = vmatpush.bf16.msra.mxu2 %v695_v3  ;;  %734 = vmatpush.bf16.msra.mxu3 %v695_v3 }
  0x39   : > { %386 = vmatpush.bf16.msra.mxu0 %v694_v4  ;;  %735 = vmatpush.bf16.msra.mxu1 %v694_v4 }
  0x3a   : > { %736 = vmatpush.bf16.msra.mxu2 %v694_v4  ;;  %737 = vmatpush.bf16.msra.mxu3 %v694_v4 }
  0x3d   : > { %387 = vmatpush.bf16.msra.mxu0 %v693_v5  ;;  %738 = vmatpush.bf16.msra.mxu1 %v693_v5 }
  0x3e   : > { %739 = vmatpush.bf16.msra.mxu2 %v693_v5  ;;  %740 = vmatpush.bf16.msra.mxu3 %v693_v5 }
  0x41   : > { %388 = vmatpush.bf16.msra.mxu0 %v692_v6  ;;  %741 = vmatpush.bf16.msra.mxu1 %v692_v6 }
  0x42   : > { %742 = vmatpush.bf16.msra.mxu2 %v692_v6  ;;  %743 = vmatpush.bf16.msra.mxu3 %v692_v6 }
  0x45   : > { %389 = vmatpush.bf16.msra.mxu0 %v691_v7  ;;  %744 = vmatpush.bf16.msra.mxu1 %v691_v7 }
  0x46   : > { %745 = vmatpush.bf16.msra.mxu2 %v691_v7  ;;  %746 = vmatpush.bf16.msra.mxu3 %v691_v7 }
  0x48   : > { %390 = vmatmul.bf16.vlgmr.msra.gmra.mxu0 %v687_v8  ;;  %395 = vmatmul.bf16.vlgmr.msra.gmra.mxu1 %v688_v9 }
  0x49   : > { %400 = vmatmul.bf16.vlgmr.msra.gmra.mxu2 %v689_v10  ;;  %405 = vmatmul.bf16.vlgmr.msra.gmra.mxu3 %v690_v11 }
  0xc5   : > { %v391_v14 = vpop.f32.mrf.mxu0  ;;  %v396_v15 = vpop.f32.mrf.mxu1 }
  0xc6   : > { %v415_v16 = vmul.f32 %v888_v12, %v391_v14  ;;  %v417_v17 = vmul.f32 %v888_v12, %v396_v15 }
  0xc8   : > { %v427_v18 = vadd.f32 %v889_v13, %v415_v16  ;;  %v429_v19 = vadd.f32 %v889_v13, %v417_v17 }
  0xca   : > { %v435_v20 = vmax.f32 %v427_v18, 0.0  ;;  %v437_v21 = vmax.f32 %v429_v19, 0.0 }
  0xcc   : > { %v443_v22 = vmin.f32 %v435_v20, 1.0  ;;  %v445_v23 = vmin.f32 %v437_v21, 1.0  ;;  %v401_v24 = vpop.f32.mrf.mxu2  ;;  %v406_v25 = vpop.f32.mrf.mxu3 }
  0xcd   : > { %v419_v26 = vmul.f32 %v888_v12, %v401_v24  ;;  %v421_v27 = vmul.f32 %v888_v12, %v406_v25  ;;  %v393_v28 = vpop.f32.mrf.mxu0  ;;  %v398_v29 = vpop.f32.mrf.mxu1 }
  0xce   : > { %v1199_v30 = vmul.f32 15.0, %v443_v22  ;;  %v416_v31 = vmul.f32 %v888_v12, %v393_v28  ;;  %v418_v34 = vmul.f32 %v888_v12, %v398_v29  ;;  %v1201_v35 = vmul.f32 15.0, %v445_v23 }
  0xcf   : > { %v431_v32 = vadd.f32 %v889_v13, %v419_v26  ;;  %v433_v33 = vadd.f32 %v889_v13, %v421_v27 }
  0xd0   : > { %v749_v36 = vcvt.f32.s32 %v1199_v30  ;;  %v428_v39 = vadd.f32 %v889_v13, %v416_v31  ;;  %v430_v41 = vadd.f32 %v889_v13, %v418_v34  ;;  %v765_v42 = vcvt.f32.s32 %v1201_v35 }
  0xd1   : > { %v439_v37 = vmax.f32 %v431_v32, 0.0  ;;  %v441_v38 = vmax.f32 %v433_v33, 0.0  ;;  %v752_v55 = vand.u32 2147483648, %v1199_v30  ;;  %v747_v61 = vand.u32 2147483647, %v1199_v30 }
  0xd2   : > { %v436_v43 = vmax.f32 %v428_v39, 0.0  ;;  %v750_v45 = vcvt.s32.f32 %v749_v36  ;;  %v438_v50 = vmax.f32 %v430_v41, 0.0  ;;  %v766_v52 = vcvt.s32.f32 %v765_v42 }
  0xd3   : > { %v447_v40 = vmin.f32 %v439_v37, 1.0  ;;  %v449_v46 = vmin.f32 %v441_v38, 1.0  ;;  %v763_v62 = vand.u32 2147483647, %v1201_v35  ;;  %v768_v63 = vand.u32 2147483648, %v1201_v35 }
  0xd4   : > { %v403_v44 = vpop.f32.mrf.mxu2  ;;  %v408_v47 = vpop.f32.mrf.mxu3  ;;  %v444_v49 = vmin.f32 %v436_v43, 1.0  ;;  %v751_v54 = vand.u32 2147483647, %v750_v45  ;;  %v446_v59 = vmin.f32 %v438_v50, 1.0  ;;  %v767_v1 = vand.u32 2147483647, %v766_v52 }
  0xd5   : > { %v1205_v48 = vmul.f32 15.0, %v447_v40  ;;  %v420_v51 = vmul.f32 %v888_v12, %v403_v44  ;;  %v422_v53 = vmul.f32 %v888_v12, %v408_v47  ;;  %v1209_v58 = vmul.f32 15.0, %v449_v46 }
  0xd6   : > { %v452_v56 = vmul.f32 15.0, %v444_v49  ;;  %v454_v2 = vmul.f32 15.0, %v446_v59  ;;  %v753_v5 = vor.u32 %v752_v55, %v751_v54  ;;  %vm1215_vm0 = vcmp.lt.f32.partialorder %v747_v61, 8388608.0 }
  0xd7   : > { %v781_v57 = vcvt.f32.s32 %v1205_v48  ;;  %v432_v60 = vadd.f32 %v889_v13, %v420_v51  ;;  %v434_v4 = vadd.f32 %v889_v13, %v422_v53  ;;  %v797_v8 = vcvt.f32.s32 %v1209_v58 }
  0xd8   : > { %v757_v0 = vcvt.f32.s32 %v452_v56  ;;  %v755_v9 = vand.u32 2147483647, %v452_v56  ;;  %v773_v10 = vcvt.f32.s32 %v454_v2  ;;  %v760_v12 = vand.u32 2147483648, %v452_v56 }
  0xd9   : > { %v440_v3 = vmax.f32 %v432_v60, 0.0  ;;  %v782_v7 = vcvt.s32.f32 %v781_v57  ;;  %v442_v15 = vmax.f32 %v434_v4, 0.0  ;;  %vm1219_vm1 = vcmp.lt.f32.partialorder %v763_v62, 8388608.0 }
  0xda   : > { %v758_v6 = vcvt.s32.f32 %v757_v0  ;;  %v769_v13 = vor.u32 %v768_v63, %v767_v1  ;;  %v774_v18 = vcvt.s32.f32 %v773_v10  ;;  %v771_v20 = vand.u32 2147483647, %v454_v2 }
  0xdb   : > { %v448_v14 = vmin.f32 %v440_v3, 1.0  ;;  %v450_v22 = vmin.f32 %v442_v15, 1.0  ;;  %v798_v23 = vcvt.s32.f32 %v797_v8  ;;  %vm756_vm2 = vcmp.lt.f32.partialorder %v755_v9, 8388608.0 }
  0xdc   : > { %v759_v11 = vand.u32 2147483647, %v758_v6  ;;  %v775_v24 = vand.u32 2147483647, %v774_v18  ;;  %v776_v25 = vand.u32 2147483648, %v454_v2  ;;  %v754_v26 = vsel %vm1215_vm0, %v753_v5, %v1199_v30 }
  0xdd   : > { %v456_v21 = vmul.f32 15.0, %v448_v14  ;;  %v783_v27 = vand.u32 2147483647, %v782_v7  ;;  %v779_v31 = vand.u32 2147483647, %v1205_v48  ;;  %v458_v34 = vmul.f32 15.0, %v450_v22 }
  0xde   : > { %v761_v19 = vor.u32 %v760_v12, %v759_v11  ;;  %v777_v33 = vor.u32 %v776_v25, %v775_v24  ;;  %v770_v36 = vsel %vm1219_vm1, %v769_v13, %v1201_v35  ;;  %v784_v37 = vand.u32 2147483648, %v1205_v48 }
  0xdf   : > { %v789_v29 = vcvt.f32.s32 %v456_v21  ;;  %vm772_vm3 = vcmp.lt.f32.partialorder %v771_v20, 8388608.0  ;;  %v799_v39 = vand.u32 2147483647, %v798_v23  ;;  %v787_v40 = vand.u32 2147483647, %v456_v21 }
  0xe0   : > { %v762_v28 = vsel %vm756_vm2, %v761_v19, %v452_v56  ;;  %v778_v30 = vsel %vm772_vm3, %v777_v33, %v454_v2  ;;  %v805_v41 = vcvt.f32.s32 %v458_v34  ;;  %v785_v42 = vor.u32 %v784_v37, %v783_v27 }
  0xe1   : > { %v703_v32 = vpack.c.bf16 %v762_v28, %v754_v26  ;;  %v790_v38 = vcvt.s32.f32 %v789_v29  ;;  %v708_v43 = vpack.c.bf16 %v778_v30, %v770_v36  ;;  %v792_v35 = vand.u32 2147483648, %v456_v21 }
  0xe2   : > { %v800_v45 = vand.u32 2147483648, %v1209_v58  ;;  %v806_v46 = vcvt.s32.f32 %v805_v41  ;;  %vm780_vm4 = vcmp.lt.f32.partialorder %v779_v31, 8388608.0  ;;  %v795_v47 = vand.u32 2147483647, %v1209_v58 }
  0xe3   : > { %704 = vst [vmem:[%s1234_s8] sm:$0xff] %v703_v32   ;;  %v791_v44 = vand.u32 2147483647, %v790_v38  ;;  %v803_v50 = vand.u32 2147483647, %v458_v34  ;;  %vm788_vm5 = vcmp.lt.f32.partialorder %v787_v40, 8388608.0  ;;  %v808_v53 = vand.u32 2147483648, %v458_v34 }
  0xe4   : > { %720 = vst [vmem:[%s1234_s8 + $0x8] sm:$0xff] %v708_v43   ;;  %v801_v51 = vor.u32 %v800_v45, %v799_v39  ;;  %v807_v52 = vand.u32 2147483647, %v806_v46  ;;  %v786_v54 = vsel %vm780_vm4, %v785_v42, %v1205_v48  ;;  %vm796_vm6 = vcmp.lt.f32.partialorder %v795_v47, 8388608.0 }
  0xe5   : > { %v793_v49 = vor.u32 %v792_v35, %v791_v44  ;;  %vm804_vm7 = vcmp.lt.f32.partialorder %v803_v50, 8388608.0 }
  0xe6   : > { %v809_v57 = vor.u32 %v808_v53, %v807_v52  ;;  %v802_v59 = vsel %vm796_vm6, %v801_v51, %v1209_v58 }
  0xe7   : > { %v794_v55 = vsel %vm788_vm5, %v793_v49, %v456_v21 }
  0xe8   : > { %v713_v56 = vpack.c.bf16 %v794_v55, %v786_v54  ;;  %v810_v60 = vsel %vm804_vm7, %v809_v57, %v458_v34 }
  0xe9   : > { %v718_v61 = vpack.c.bf16 %v810_v60, %v802_v59 }
  0xea   : > { %721 = vst [vmem:[%s1234_s8 + $0x10] sm:$0xff] %v713_v56  }
  0xeb   : > { %722 = vst [vmem:[%s1234_s8 + $0x18] sm:$0xff] %v718_v61  }
  0xec   : > { %977 = shalt.err (!%p974_p0)
}
  0xed   : > { %s1041_s10 = smov 64   ;;  %s1042_s23 = smov 4  }
  0xee   : > { %817 = dma.vmem_to_hbm [thread:$0]  (%p1150_p5), %s498_s27, 512, %s500_s28, %s484_s29, %s1041_s10, %s1041_s10, %s1042_s23  }
  0xef PF: > { %s514_s25 = sand.u32 1, %s1016_s15   ;;  %p828_p3 = pnand %p625_p11, %p1117_p6 }
  0xf0   : > { %s515_s30 = scalar_lea.sflag [#allocation4], %s514_s25 }
  0xf1   : > { %p829_p7 = pneg %p828_p3 }
  0xf3   : > { %1011 = dma.done.wait (%p829_p7), %s515_s30, 512  }
  0xf4   : > { %1013 = vsyncadd (%p829_p7), %s515_s30, 4294966784  ;;  %s21_s20 = sadd.s32 1, %s1036_s20   ;;  %s1306_s12 = sld [smem:[#allocation11_spill]] }
  0xf5   : > { %p18_p9 = scmp.ge.s32.totalorder %s21_s20, 4   ;;  %s1307_s15 = smov %s1020_s16 }
  0xf6   : > { %s1308_s16 = smov %s1024_s17  ;;  %s1309_s17 = smov %s1159_s22 }
  0xf7   : > { %s1310_s18 = smov %s1032_s19  ;;  %20 = sbr.rel (!%p18_p9) target bundleno = 9 (0x9), region = 92 }
  0xfa   : > { %s1311_s19 = smov %s1306_s12 }
  0xfc   :  { %521 = vsyncpa [#allocation3], 1 }
  0xfd   :  { %523 = vsyncpa [#allocation3 + $0x1], 1 }
  0xfe   :  { %524 = vsyncpa [#allocation6], 1 }
  0xff   :  { %525 = vsyncpa [#allocation4], 1 }
 0x100   :  { %527 = vsyncpa [#allocation4 + $0x1], 1 }

</bundles_post_ra>
